<compile_context>
chip_gen: v7x
topology: tpu7x:2x2x1
jax: 0.10.0
libtpu: 0.0.40
codegen_flags: <defaults>
</compile_context>

<pallas_src>
import functools

import jax
import jax.numpy as jnp
from jax.experimental import pallas as pl
from jax.experimental.pallas import tpu as pltpu

_LANE = 128      # lane width (last-dim alignment for resident weights)
_SUBLANE = 8     # sublane width (second-to-last dim alignment)


def _round_up(a, m):
    return (a + m - 1) // m * m


def _mlp_kernel(t_ref, x_ref, w1_ref, w1t_ref, b1_ref, w2_ref, b2_ref,
                w3_ref, b3_ref, o_ref):
    """One batch tile of the flow-matching MLP.

    t_ref : (1,1) f32 scalar time in SMEM
    x_ref : [TB, D]  native-width activations (D small, e.g. 4)
    w1_ref: [D, Hp] f32, w1t_ref/b1_ref: [1, Hp] f32 (lane-padded, resident)
    w2_ref: [Hp, Hp] bf16, w3_ref: [Hp, D] bf16, b2: [1, Hp] f32, b3: [1, D] f32
    o_ref : [TB, D]  native-width output
    """
    t = t_ref[0, 0]                                     # scalar time (f32)
    x = x_ref[...].astype(jnp.float32)                  # [TB, D]

    # ---- Layer 1: concat([x, t]) @ W1 + b1 -----------------------------
    # Time column folded in via the resident w1t row; the x part is D
    # broadcast-FMAs on the VPU (keeps x at native width -> no padded HBM
    # stream, no 97%-zero MXU matmul).
    h = b1_ref[...] + t * w1t_ref[...]                  # [1, Hp]
    for d in range(x_ref.shape[1]):                     # static tiny D
        h = h + x[:, d:d + 1] * w1_ref[d:d + 1, :]      # [TB,1]*[1,Hp]->[TB,Hp]
    h = h * pl.reciprocal(1.0 + jnp.exp(-h), approx=True)      # SiLU on EUP

    # ---- Layer 2: bf16 MXU matmul, f32 accumulate ----------------------
    h = jnp.dot(h.astype(w2_ref.dtype), w2_ref[...],
                preferred_element_type=jnp.float32) + b2_ref[...]
    h = h * pl.reciprocal(1.0 + jnp.exp(-h), approx=True)      # SiLU on EUP

    # ---- Layer 3: velocity field, output at native width D -------------
    o_ref[...] = (jnp.dot(h.astype(w3_ref.dtype), w3_ref[...],
                          preferred_element_type=jnp.float32)
                  + b3_ref[...]).astype(o_ref.dtype)


def prepare_params(params, *, matmul_dtype=jnp.bfloat16):
    """One-time setup: lane-pad + cast the weights (NOT in the per-call path)."""
    D, H = params["w1x"].shape
    Hp = _round_up(H, _LANE)

    def pad_cast(a, rows, cols, dtype):
        a = a.astype(dtype)
        return jnp.pad(a, ((0, rows - a.shape[0]), (0, cols - a.shape[1])))

    return {
        "w1x": pad_cast(params["w1x"], D, Hp, jnp.float32),   # VPU FMAs -> f32
        "w1t": pad_cast(params["w1t"], 1, Hp, jnp.float32),
        "b1":  pad_cast(params["b1"],  1, Hp, jnp.float32),
        "w2":  pad_cast(params["w2"],  Hp, Hp, matmul_dtype),
        "b2":  pad_cast(params["b2"],  1, Hp, jnp.float32),
        "w3":  pad_cast(params["w3"],  Hp, D, matmul_dtype),  # output stays D-wide
        "b3":  params["b3"].astype(jnp.float32),              # [1, D]
    }


@functools.partial(jax.jit, static_argnames=("batch_tile",))
def torch_wrapper_forward(t, x, prep, *, batch_tile=1024):
    """JAX/Pallas equivalent of torch_wrapper.forward(t, x) with use_t=True.

    `prep` is the output of prepare_params (weights padded/cast once)."""
    B, D = x.shape
    assert prep["w1x"].shape[0] == D and prep["w3"].shape[1] == D
    Hp = prep["w1x"].shape[1]
    dt = x.dtype

    # Batch tile: multiple of 8; ensure >= 2 grid steps when possible so
    # v7x's two TensorCores both get tiles (neutral on v5e/v6e).
    bt = max(_SUBLANE, _round_up(int(batch_tile), _SUBLANE))
    tile = min(bt, _round_up(B, _SUBLANE))
    if _round_up(B, _SUBLANE) // tile < 2 and B > _SUBLANE:
        tile = _round_up((B + 1) // 2, _SUBLANE)
    Bp = _round_up(B, tile)
    grid = (Bp // tile,)

    # ---- per-call glue: row-pad x, pack scalar t (no weight-sized work) ----
    x_p = jnp.pad(x, ((0, Bp - B), (0, 0)))
    t_arr = jnp.asarray(t, jnp.float32).reshape(1, 1)

    weight_bytes = sum(prep[k].size * prep[k].dtype.itemsize
                       for k in ("w1x", "w1t", "b1", "w2", "b2", "w3", "b3"))
    cost = pl.CostEstimate(
        flops=2 * Bp * (D * Hp + Hp * Hp + Hp * D),
        transcendentals=2 * Bp * Hp,                      # 2 SiLUs (exp + rcp)
        bytes_accessed=(x_p.size * x_p.dtype.itemsize     # x read (native width)
                        + Bp * D * jnp.dtype(dt).itemsize  # out write (native width)
                        + weight_bytes),                   # resident weights, once
    )

    out = pl.pallas_call(
        _mlp_kernel,
        out_shape=jax.ShapeDtypeStruct((Bp, D), dt),
        grid_spec=pltpu.PrefetchScalarGridSpec(
            num_scalar_prefetch=0,
            grid=grid,
            in_specs=[
                pl.BlockSpec(memory_space=pltpu.MemorySpace.SMEM),  # t (1,1)
                pl.BlockSpec((tile, D), lambda i: (i, 0)),   # x tile, native width
                pl.BlockSpec((D, Hp), lambda i: (0, 0)),     # W1 (x part), resident
                pl.BlockSpec((1, Hp), lambda i: (0, 0)),     # W1 (t row)
                pl.BlockSpec((1, Hp), lambda i: (0, 0)),     # b1
                pl.BlockSpec((Hp, Hp), lambda i: (0, 0)),    # W2 (bf16), resident
                pl.BlockSpec((1, Hp), lambda i: (0, 0)),     # b2
                pl.BlockSpec((Hp, D), lambda i: (0, 0)),     # W3 (bf16), resident
                pl.BlockSpec((1, D), lambda i: (0, 0)),      # b3
            ],
            out_specs=pl.BlockSpec((tile, D), lambda i: (i, 0)),  # native width
        ),
        compiler_params=pltpu.CompilerParams(
            dimension_semantics=("parallel",)),   # batch tiles shard across TCs
        cost_estimate=cost,
    )(t_arr, x_p, prep["w1x"], prep["w1t"], prep["b1"],
      prep["w2"], prep["b2"], prep["w3"], prep["b3"])

    return out[:B]


def init_params(key, dim, hidden):
    """Deterministic synthetic parameters matching the MLP's __init__ shapes."""
    k1, k2, k3, k4, k5, k6 = jax.random.split(key, 6)
    # Torch Linear(dim+1, hidden) weight, stored split into the x part
    # [dim, hidden] and the time part [1, hidden].
    w1_full = jax.random.normal(k1, (dim + 1, hidden), jnp.float32) * 0.1
    return {
        "w1x": w1_full[:dim, :],
        "w1t": w1_full[dim:, :],
        "b1":  jax.random.normal(k4, (1, hidden), jnp.float32) * 0.05,
        "w2":  jax.random.normal(k2, (hidden, hidden), jnp.float32) * 0.1,
        "b2":  jax.random.normal(k5, (1, hidden), jnp.float32) * 0.05,
        "w3":  jax.random.normal(k3, (hidden, dim), jnp.float32) * 0.1,
        "b3":  jax.random.normal(k6, (1, dim), jnp.float32) * 0.05,
    }


def _reference_forward(t, x, params):
    """Pure-JAX f32 reference of torch_wrapper.forward (for sanity checking)."""
    B = x.shape[0]
    t_col = jnp.broadcast_to(jnp.reshape(t, (1, 1)).astype(x.dtype), (B, 1))
    h = x @ params["w1x"] + t_col @ params["w1t"] + params["b1"]
    h = h * jax.nn.sigmoid(h)
    h = h @ params["w2"] + params["b2"]
    h = h * jax.nn.sigmoid(h)
    return h @ params["w3"] + params["b3"]


if __name__ == "__main__":
    key = jax.random.PRNGKey(0)
    kx, kt, kp = jax.random.split(key, 3)

    B, D, H = 256, 4, 32                          # small flow-matching problem
    x = jax.random.normal(kx, (B, D), jnp.float32)
    t = jax.random.uniform(kt, (), jnp.float32)   # scalar time, as in torchdyn

    params = init_params(kp, D, H)
    prep = prepare_params(params)                 # one-time setup (hoisted)

    out = jax.block_until_ready(torch_wrapper_forward(t, x, prep))
    ref = _reference_forward(t, x, params)
    assert out.shape == (B, D)
    # Tolerance accounts for bf16 matmul operands + approx EUP reciprocal.
    assert jnp.allclose(out, ref, atol=1e-2, rtol=1e-2), \
        float(jnp.max(jnp.abs(out - ref)))

    # Ragged batch size (typical of ODE-solver intermediate evaluations).
    x_odd = x[:100]
    out_odd = jax.block_until_ready(torch_wrapper_forward(t, x_odd, prep))
    assert out_odd.shape == (100, D)
    assert jnp.allclose(out_odd, _reference_forward(t, x_odd, params),
                        atol=1e-2, rtol=1e-2)

    # TODO(synk): the use_t=False branch (model(x=x) + warning print) is not
    # implemented; only the use_t=True torchdyn path is covered.
    print("KERNEL_OK")
</pallas_src>

<mosaic_0001>
module attributes {stable_mosaic.version = 11 : i64} {
  func.func @_mlp_kernel(%arg0: i32, %arg1: memref<1x1xf32, #tpu.memory_space<smem>>, %arg2: memref<128x4xf32, #tpu.memory_space<vmem>>, %arg3: memref<4x128xf32, #tpu.memory_space<vmem>>, %arg4: memref<1x128xf32, #tpu.memory_space<vmem>>, %arg5: memref<1x128xf32, #tpu.memory_space<vmem>>, %arg6: memref<128x128xbf16, #tpu.memory_space<vmem>>, %arg7: memref<1x128xf32, #tpu.memory_space<vmem>>, %arg8: memref<128x4xbf16, #tpu.memory_space<vmem>>, %arg9: memref<1x4xf32, #tpu.memory_space<vmem>>, %arg10: memref<128x4xf32, #tpu.memory_space<vmem>>) attributes {dimension_semantics = [#tpu.dimension_semantics<parallel>], iteration_bounds = array<i64: 2>, scalar_prefetch = 0 : i64, scratch_operands = 0 : i64, tpu.core_type = #tpu.core_type<tc>, window_params = [{transform_indices = @transform_0, window_bounds = array<i64: 1, 1>}, {transform_indices = @transform_1, window_bounds = array<i64: 128, 4>}, {pipeline_mode = #tpu.pipeline_mode<synchronous>, transform_indices = @transform_2, window_bounds = array<i64: 4, 128>}, {pipeline_mode = #tpu.pipeline_mode<synchronous>, transform_indices = @transform_3, window_bounds = array<i64: 1, 128>}, {pipeline_mode = #tpu.pipeline_mode<synchronous>, transform_indices = @transform_4, window_bounds = array<i64: 1, 128>}, {pipeline_mode = #tpu.pipeline_mode<synchronous>, transform_indices = @transform_5, window_bounds = array<i64: 128, 128>}, {pipeline_mode = #tpu.pipeline_mode<synchronous>, transform_indices = @transform_6, window_bounds = array<i64: 1, 128>}, {pipeline_mode = #tpu.pipeline_mode<synchronous>, transform_indices = @transform_7, window_bounds = array<i64: 128, 4>}, {pipeline_mode = #tpu.pipeline_mode<synchronous>, transform_indices = @transform_8, window_bounds = array<i64: 1, 4>}, {transform_indices = @transform_9, window_bounds = array<i64: 128, 4>}]} {
    %c0 = arith.constant 0 : index
    %c0_0 = arith.constant 0 : index
    %0 = memref.load %arg1[%c0, %c0_0] : memref<1x1xf32, #tpu.memory_space<smem>>
    %c0_1 = arith.constant 0 : index
    %c0_2 = arith.constant 0 : index
    %1 = vector.load %arg2[%c0_1, %c0_2] : memref<128x4xf32, #tpu.memory_space<vmem>>, vector<128x4xf32>
    %c0_3 = arith.constant 0 : index
    %c0_4 = arith.constant 0 : index
    %2 = vector.load %arg5[%c0_3, %c0_4] : memref<1x128xf32, #tpu.memory_space<vmem>>, vector<1x128xf32>
    %c0_5 = arith.constant 0 : index
    %c0_6 = arith.constant 0 : index
    %3 = vector.load %arg4[%c0_5, %c0_6] : memref<1x128xf32, #tpu.memory_space<vmem>>, vector<1x128xf32>
    %4 = vector.broadcast %0 : f32 to vector<1x128xf32>
    %5 = arith.mulf %4, %3 : vector<1x128xf32>
    %6 = arith.addf %2, %5 : vector<1x128xf32>
    %7 = vector.extract_strided_slice %1 {offsets = [0, 0], sizes = [128, 1], strides = [1, 1]} : vector<128x4xf32> to vector<128x1xf32>
    %c0_7 = arith.constant 0 : index
    %c0_8 = arith.constant 0 : index
    %8 = vector.load %arg3[%c0_7, %c0_8] : memref<4x128xf32, #tpu.memory_space<vmem>>, vector<1x128xf32>
    %9 = vector.broadcast %7 : vector<128x1xf32> to vector<128x128xf32>
    %10 = vector.broadcast %8 : vector<1x128xf32> to vector<128x128xf32>
    %11 = arith.mulf %9, %10 : vector<128x128xf32>
    %12 = vector.broadcast %6 : vector<1x128xf32> to vector<128x128xf32>
    %13 = arith.addf %12, %11 : vector<128x128xf32>
    %14 = vector.extract_strided_slice %1 {offsets = [0, 1], sizes = [128, 1], strides = [1, 1]} : vector<128x4xf32> to vector<128x1xf32>
    %c1 = arith.constant 1 : index
    %c0_9 = arith.constant 0 : index
    %15 = vector.load %arg3[%c1, %c0_9] : memref<4x128xf32, #tpu.memory_space<vmem>>, vector<1x128xf32>
    %16 = vector.broadcast %14 : vector<128x1xf32> to vector<128x128xf32>
    %17 = vector.broadcast %15 : vector<1x128xf32> to vector<128x128xf32>
    %18 = arith.mulf %16, %17 : vector<128x128xf32>
    %19 = arith.addf %13, %18 : vector<128x128xf32>
    %20 = vector.extract_strided_slice %1 {offsets = [0, 2], sizes = [128, 1], strides = [1, 1]} : vector<128x4xf32> to vector<128x1xf32>
    %c2 = arith.constant 2 : index
    %c0_10 = arith.constant 0 : index
    %21 = vector.load %arg3[%c2, %c0_10] : memref<4x128xf32, #tpu.memory_space<vmem>>, vector<1x128xf32>
    %22 = vector.broadcast %20 : vector<128x1xf32> to vector<128x128xf32>
    %23 = vector.broadcast %21 : vector<1x128xf32> to vector<128x128xf32>
    %24 = arith.mulf %22, %23 : vector<128x128xf32>
    %25 = arith.addf %19, %24 : vector<128x128xf32>
    %26 = vector.extract_strided_slice %1 {offsets = [0, 3], sizes = [128, 1], strides = [1, 1]} : vector<128x4xf32> to vector<128x1xf32>
    %c3 = arith.constant 3 : index
    %c0_11 = arith.constant 0 : index
    %27 = vector.load %arg3[%c3, %c0_11] : memref<4x128xf32, #tpu.memory_space<vmem>>, vector<1x128xf32>
    %28 = vector.broadcast %26 : vector<128x1xf32> to vector<128x128xf32>
    %29 = vector.broadcast %27 : vector<1x128xf32> to vector<128x128xf32>
    %30 = arith.mulf %28, %29 : vector<128x128xf32>
    %31 = arith.addf %25, %30 : vector<128x128xf32>
    %cst = arith.constant 0.000000e+00 : f32
    %32 = vector.broadcast %cst : f32 to vector<128x128xf32>
    %33 = arith.subf %32, %31 : vector<128x128xf32>
    %34 = math.exp %33 : vector<128x128xf32>
    %cst_12 = arith.constant 1.000000e+00 : f32
    %35 = vector.broadcast %cst_12 : f32 to vector<128x128xf32>
    %36 = arith.addf %35, %34 : vector<128x128xf32>
    %37 = tpu.reciprocal %36 {approx = true} : vector<128x128xf32> -> vector<128x128xf32>
    %38 = arith.mulf %31, %37 : vector<128x128xf32>
    %39 = arith.truncf %38 : vector<128x128xf32> to vector<128x128xbf16>
    %c0_13 = arith.constant 0 : index
    %c0_14 = arith.constant 0 : index
    %40 = vector.load %arg6[%c0_13, %c0_14] : memref<128x128xbf16, #tpu.memory_space<vmem>>, vector<128x128xbf16>
    %cst_15 = arith.constant dense<0.000000e+00> : vector<128x128xf32>
    %41 = tpu.matmul %39, %40, %cst_15 {dimension_numbers = #tpu.dot_dimension_numbers<[1], [0], [0], [1], [0, 0, 1, 1], [], []>} : vector<128x128xbf16>, vector<128x128xbf16>, vector<128x128xf32> -> vector<128x128xf32>
    %c0_16 = arith.constant 0 : index
    %c0_17 = arith.constant 0 : index
    %42 = vector.load %arg7[%c0_16, %c0_17] : memref<1x128xf32, #tpu.memory_space<vmem>>, vector<1x128xf32>
    %43 = vector.broadcast %42 : vector<1x128xf32> to vector<128x128xf32>
    %44 = arith.addf %41, %43 : vector<128x128xf32>
    %cst_18 = arith.constant 0.000000e+00 : f32
    %45 = vector.broadcast %cst_18 : f32 to vector<128x128xf32>
    %46 = arith.subf %45, %44 : vector<128x128xf32>
    %47 = math.exp %46 : vector<128x128xf32>
    %cst_19 = arith.constant 1.000000e+00 : f32
    %48 = vector.broadcast %cst_19 : f32 to vector<128x128xf32>
    %49 = arith.addf %48, %47 : vector<128x128xf32>
    %50 = tpu.reciprocal %49 {approx = true} : vector<128x128xf32> -> vector<128x128xf32>
    %51 = arith.mulf %44, %50 : vector<128x128xf32>
    %52 = arith.truncf %51 : vector<128x128xf32> to vector<128x128xbf16>
    %c0_20 = arith.constant 0 : index
    %c0_21 = arith.constant 0 : index
    %53 = vector.load %arg8[%c0_20, %c0_21] : memref<128x4xbf16, #tpu.memory_space<vmem>>, vector<128x4xbf16>
    %cst_22 = arith.constant dense<0.000000e+00> : vector<128x4xf32>
    %54 = tpu.matmul %52, %53, %cst_22 {dimension_numbers = #tpu.dot_dimension_numbers<[1], [0], [0], [1], [0, 0, 1, 1], [], []>} : vector<128x128xbf16>, vector<128x4xbf16>, vector<128x4xf32> -> vector<128x4xf32>
    %c0_23 = arith.constant 0 : index
    %c0_24 = arith.constant 0 : index
    %55 = vector.load %arg9[%c0_23, %c0_24] : memref<1x4xf32, #tpu.memory_space<vmem>>, vector<1x4xf32>
    %56 = vector.broadcast %55 : vector<1x4xf32> to vector<128x4xf32>
    %57 = arith.addf %54, %56 : vector<128x4xf32>
    %c0_25 = arith.constant 0 : index
    %c0_26 = arith.constant 0 : index
    %58 = vector.load %arg10[%c0_25, %c0_26] : memref<128x4xf32, #tpu.memory_space<vmem>>, vector<128x4xf32>
    tpu.vector_store %arg10[%c0_25, %c0_26], %57 {strides = array<i32>} : memref<128x4xf32, #tpu.memory_space<vmem>>, vector<128x4xf32>,
    return
  }
  func.func @transform_0(%arg0: i32) -> (i32, i32) {
    %c0_i32 = arith.constant 0 : i32
    %c0_i32_0 = arith.constant 0 : i32
    %c0_i32_1 = arith.constant 0 : i32
    return %c0_i32, %c0_i32_0 : i32, i32
  }
  func.func @transform_1(%arg0: i32) -> (i32, i32) {
    %c0_i32 = arith.constant 0 : i32
    %c0_i32_0 = arith.constant 0 : i32
    return %arg0, %c0_i32 : i32, i32
  }
  func.func @transform_2(%arg0: i32) -> (i32, i32) {
    %c0_i32 = arith.constant 0 : i32
    %c0_i32_0 = arith.constant 0 : i32
    %c0_i32_1 = arith.constant 0 : i32
    return %c0_i32, %c0_i32_0 : i32, i32
  }
  func.func @transform_3(%arg0: i32) -> (i32, i32) {
    %c0_i32 = arith.constant 0 : i32
    %c0_i32_0 = arith.constant 0 : i32
    %c0_i32_1 = arith.constant 0 : i32
    return %c0_i32, %c0_i32_0 : i32, i32
  }
  func.func @transform_4(%arg0: i32) -> (i32, i32) {
    %c0_i32 = arith.constant 0 : i32
    %c0_i32_0 = arith.constant 0 : i32
    %c0_i32_1 = arith.constant 0 : i32
    return %c0_i32, %c0_i32_0 : i32, i32
  }
  func.func @transform_5(%arg0: i32) -> (i32, i32) {
    %c0_i32 = arith.constant 0 : i32
    %c0_i32_0 = arith.constant 0 : i32
    %c0_i32_1 = arith.constant 0 : i32
    return %c0_i32, %c0_i32_0 : i32, i32
  }
  func.func @transform_6(%arg0: i32) -> (i32, i32) {
    %c0_i32 = arith.constant 0 : i32
    %c0_i32_0 = arith.constant 0 : i32
    %c0_i32_1 = arith.constant 0 : i32
    return %c0_i32, %c0_i32_0 : i32, i32
  }
  func.func @transform_7(%arg0: i32) -> (i32, i32) {
    %c0_i32 = arith.constant 0 : i32
    %c0_i32_0 = arith.constant 0 : i32
    %c0_i32_1 = arith.constant 0 : i32
    return %c0_i32, %c0_i32_0 : i32, i32
  }
  func.func @transform_8(%arg0: i32) -> (i32, i32) {
    %c0_i32 = arith.constant 0 : i32
    %c0_i32_0 = arith.constant 0 : i32
    %c0_i32_1 = arith.constant 0 : i32
    return %c0_i32, %c0_i32_0 : i32, i32
  }
  func.func @transform_9(%arg0: i32) -> (i32, i32) {
    %c0_i32 = arith.constant 0 : i32
    %c0_i32_0 = arith.constant 0 : i32
    return %arg0, %c0_i32 : i32, i32
  }
}

</mosaic_0001>

<bundles_post_ra>
// kernel: torch_wrapper_forward.1
= control target key start
LH: loop header
LB: loop body
LE: loop exit
PB: predicated region body
PF: predicated region fallthrough
CT: control target
= control target key end

     0   :  { %s1773_s11 = smov 0   ;;  %s2185_s0 = inlined_call_operand.<no memory space> [shape: f32[1,1], index: 0, kind: input, shape index: {}]   ;;  %s2186_s1 = inlined_call_operand.vmem [shape: f32[256,4], index: 1, kind: input, shape index: {}]   ;;  %s2187_s2 = inlined_call_operand.vmem [shape: f32[4,128], index: 2, kind: input, shape index: {}]   ;;  %s2188_s3 = inlined_call_operand.vmem [shape: f32[1,128], index: 3, kind: input, shape index: {}]   ;;  %s2189_s4 = inlined_call_operand.vmem [shape: f32[1,128], index: 4, kind: input, shape index: {}]   ;;  %s2190_s5 = inlined_call_operand.vmem [shape: bf16[128,128], index: 5, kind: input, shape index: {}]   ;;  %s2191_s6 = inlined_call_operand.vmem [shape: f32[1,128], index: 6, kind: input, shape index: {}]   ;;  %s2192_s7 = inlined_call_operand.vmem [shape: bf16[128,4], index: 7, kind: input, shape index: {}]   ;;  %s2193_s8 = inlined_call_operand.vmem [shape: f32[1,4], index: 8, kind: input, shape index: {}]   ;;  %s2194_s9 = inlined_call_operand.vmem [shape: f32[256,4], index: 9, kind: output, shape index: {}]  }
   0x1   :  { %14 = sst [smem:[#allocation2]] %s2185_s0 }
   0x2 LB: > { %s1403_s12 = sadd.s32 4294967295, %s1714_s11   ;;  %p1407_p0 = scmp.ge.s32.totalorder %s1714_s11, 1  ;;  %s1714_s11 = sphi %s1773_s11, %s20_s11  }
   0x3   : > { %p289_p1 = scmp.lt.s32.totalorder %s1714_s11, 3 }
   0x5   : > { %p290_p2 = pnand %p1407_p0, %p289_p1 }
   0x6   : > { %s1408_s13 = sshll.u32 (!%p290_p2), %s1403_s12, 4  ;;  %v1716_v0 = vmov (!%p290_p2), 0   ;;  %v1717_v7 = vmov (!%p290_p2), 1   ;;  %v1718_v9 = vmov (!%p290_p2), 2   ;;  %v1719_v11 = vmov (!%p290_p2), 3   ;;  %v1564_v18 = vld [vmem:[%s2190_s5] sm:$0xff] (!%p290_p2)  }
   0x7   : > { %293 = sbr.rel (%p290_p2) target bundleno = 817 (0x331), region = 56  ;;  %1545 = vset.pattern.permute.xlu1 (!%p290_p2), %v1716_v0  ;;  %1544 = vset.pattern.permute.xlu0 (!%p290_p2), %v1716_v0  ;;  %p326_p3 = scmp.lt.s32.totalorder (!%p290_p2), %s1408_s13, 31  ;;  %v1565_v19 = vld [vmem:[%s2190_s5 + $0x8] sm:$0xff] (!%p290_p2)   ;;  %v1566_v21 = vld [vmem:[%s2190_s5 + $0x10] sm:$0xff] (!%p290_p2)   ;;  %v1567_v22 = vld [vmem:[%s2190_s5 + $0x18] sm:$0xff] (!%p290_p2)   ;;  %v462_v47 = vlaneseq (!%p290_p2)  ;;  %vm1330_vm0 = vcmask (!%p290_p2), 31744  }
   0x8   : > { %1468 = vmatprep.subr.bf16.mxu0 (!%p290_p2), %v1564_v18  ;;  %v1568_v23 = vld [vmem:[%s2190_s5 + $0x20] sm:$0xff] (!%p290_p2)   ;;  %v1569_v24 = vld [vmem:[%s2190_s5 + $0x28] sm:$0xff] (!%p290_p2)   ;;  %v1570_v25 = vld [vmem:[%s2190_s5 + $0x30] sm:$0xff] (!%p290_p2)   ;;  %s338_s14 = sld [smem:[#allocation2]] (!%p290_p2) }
   0x9   : > { %1469 = vmatpush3.bf16.msra.mxu0 (!%p290_p2), %v1564_v18  ;;  %v1571_v26 = vld [vmem:[%s2190_s5 + $0x38] sm:$0xff] (!%p290_p2)   ;;  %v356_v48 = vld [vmem:[%s2188_s3] sm:$0x1] (!%p290_p2)  ;;  %v463_v53 = vshrl.u32 (!%p290_p2), %v462_v47, 7  ;;  %v1926_v62 = vld [vmem:[%s2187_s2 + $0x1] ss:$0 sm:$0xff] (!%p290_p2) }
   0xa   : > { %1470 = vmatprep.subr.bf16.mxu0 (!%p290_p2), %v1565_v19  ;;  %v355_v54 = vld [vmem:[%s2189_s4] sm:$0x1] (!%p290_p2) }
   0xb   : > { %v464_v58 = vsub.s32 (!%p290_p2), 0, %v463_v53  ;;  %v1920_v59 = vld [vmem:[%s2187_s2] ss:$0 sm:$0xff] (!%p290_p2) }
   0xd   : > { %1471 = vmatpush3.bf16.msra.mxu0 (!%p290_p2), %v1565_v19 }
   0xe   : > { %s2196_s13 = smov (!%p326_p3, %s1408_s13), 31  ;;  %1472 = vmatprep.subr.bf16.mxu0 %v1566_v21  ;;  %v357_v49 = vstv %s338_s14 }
   0xf   : > { %s1409_s0 = sshll.u32 %s2196_s13, 3  ;;  %v358_v52 = vmul.f32 %v357_v49, %v356_v48 }
  0x10   : > { %s1791_s16 = scalar_lea.vmem %s2186_s1, %s1409_s0  ;;  %s2148_s30 = scalar_lea.vmem %s2194_s9, %s1409_s0 }
  0x11   : > { %v341_v1 = vld [vmem:[%s1791_s16 + $0x10] sm:$0xff]  ;;  %v339_v2 = vld [vmem:[%s1791_s16] sm:$0xff]  ;;  %v342_v3 = vld [vmem:[%s1791_s16 + $0x18] sm:$0xff]  ;;  %1473 = vmatpush3.bf16.msra.mxu0 %v1566_v21  ;;  %v359_v57 = vadd.f32 %v358_v52, %v355_v54 }
  0x12   : > { %373 = vperm.xlu1 %1545, %v341_v1   ;;  %363 = vperm.xlu0 %1544, %v339_v2   ;;  %v340_v4 = vld [vmem:[%s1791_s16 + $0x8] sm:$0xff]  ;;  %v343_v10 = vld [vmem:[%s1791_s16 + $0x20] sm:$0xff]  ;;  %v346_v12 = vld [vmem:[%s1791_s16 + $0x38] sm:$0xff] }
  0x13   : > { %v344_v5 = vld [vmem:[%s1791_s16 + $0x28] sm:$0xff]  ;;  %v1813_v13 = vld [vmem:[%s1791_s16 + $0x40] sm:$0xff]  ;;  %v1817_v14 = vld [vmem:[%s1791_s16 + $0x58] sm:$0xff]  ;;  %1474 = vmatprep.subr.bf16.mxu0 %v1567_v22 }
  0x14   : > { %v1799_v6 = vld [vmem:[%s1791_s16 + $0x48] sm:$0xff]  ;;  %v345_v15 = vld [vmem:[%s1791_s16 + $0x30] sm:$0xff]  ;;  %v1823_v16 = vld [vmem:[%s1791_s16 + $0x60] sm:$0xff] }
  0x15   : > { %v1804_v8 = vld [vmem:[%s1791_s16 + $0x68] sm:$0xff]  ;;  %v1827_v17 = vld [vmem:[%s1791_s16 + $0x78] sm:$0xff]  ;;  %v349_v20 = vld [vmem:[%s1791_s16 + $0x50] sm:$0xff]  ;;  %1475 = vmatpush3.bf16.msra.mxu0 %v1567_v22 }
  0x16   : > { %378 = vperm.xlu1 %1545, %v342_v3   ;;  %368 = vperm.xlu0 %1544, %v340_v4   ;;  %v353_v29 = vld [vmem:[%s1791_s16 + $0x70] sm:$0xff] }
  0x17   : > { %1476 = vmatprep.subr.bf16.mxu0 %v1568_v23 }
  0x19   : > { %1477 = vmatpush3.bf16.msra.mxu0 %v1568_v23 }
  0x1a   : > { %1546 = vset.pattern.permute.xlu1 %v1717_v7  ;;  %388 = vperm.xlu0 %1544, %v344_v5  }
  0x1b   : > { %489 = vperm.xlu1 %1546, %v340_v4   ;;  %1478 = vmatprep.subr.bf16.mxu0 %v1569_v24 }
  0x1d   : > { %1479 = vmatpush3.bf16.msra.mxu0 %v1569_v24 }
  0x1e   : > { %408 = vperm.xlu0 %1544, %v1799_v6   ;;  %1480 = vmatprep.subr.bf16.mxu0 %v1570_v25 }
  0x1f   : > { %493 = vperm.xlu1 %1546, %v341_v1  }
  0x21   : > { %1481 = vmatpush3.bf16.msra.mxu0 %v1570_v25 }
  0x22   : > { %428 = vperm.xlu0 %1544, %v1804_v8   ;;  %1482 = vmatprep.subr.bf16.mxu0 %v1571_v26 }
  0x23   : > { %1547 = vset.pattern.permute.xlu1 %v1718_v9 }
  0x24   : > { %586 = vperm.xlu1 %1547, %v339_v2  }
  0x25   : > { %1483 = vmatpush3.bf16.msra.mxu0 %v1571_v26 }
  0x26   : > { %1558 = vset.pattern.permute.xlu0 %v1717_v7 }
  0x27   : > { %485 = vperm.xlu0 %1558, %v339_v2  }
  0x28   : > { %594 = vperm.xlu1 %1547, %v341_v1  }
  0x2b   : > { %497 = vperm.xlu0 %1558, %v342_v3  }
  0x2c   : > { %598 = vperm.xlu1 %1547, %v342_v3  }
  0x2f   : > { %501 = vperm.xlu0 %1558, %v343_v10  }
  0x30   : > { %1548 = vset.pattern.permute.xlu1 %v1719_v11 }
  0x31   : > { %691 = vperm.xlu1 %1548, %v340_v4  }
  0x33   : > { %513 = vperm.xlu0 %1558, %v346_v12  }
  0x35   : > { %695 = vperm.xlu1 %1548, %v341_v1  }
  0x37   : > { %517 = vperm.xlu0 %1558, %v1813_v13  }
  0x39   : > { %1549 = vset.pattern.permute.xlu1 %v1716_v0 }
  0x3a   : > { %383 = vperm.xlu1 %1549, %v343_v10  }
  0x3b   : > { %529 = vperm.xlu0 %1558, %v1817_v14  }
  0x3e   : > { %393 = vperm.xlu1 %1549, %v345_v15  }
  0x3f   : > { %533 = vperm.xlu0 %1558, %v1823_v16  }
  0x42   : > { %398 = vperm.xlu1 %1549, %v346_v12  }
  0x43   : > { %545 = vperm.xlu0 %1558, %v1827_v17  }
  0x46   : > { %1550 = vset.pattern.permute.xlu1 %v1717_v7 }
  0x47   : > { %505 = vperm.xlu1 %1550, %v344_v5   ;;  %1560 = vset.pattern.permute.xlu0 %v1718_v9 }
  0x48   : > { %590 = vperm.xlu0 %1560, %v340_v4   ;;  %v1937_v4 = vld [vmem:[%s2187_s2 + $0x2] ss:$0 sm:$0xff] }
  0x4b   : > { %509 = vperm.xlu1 %1550, %v345_v15  }
  0x4c   : > { %606 = vperm.xlu0 %1560, %v344_v5  }
  0x4f   : > { %1551 = vset.pattern.permute.xlu1 %v1718_v9 }
  0x50   : > { %602 = vperm.xlu1 %1551, %v343_v10   ;;  %622 = vperm.xlu0 %1560, %v1799_v6  }
  0x54   : > { %610 = vperm.xlu1 %1551, %v345_v15   ;;  %638 = vperm.xlu0 %1560, %v1804_v8  }
  0x58   : > { %614 = vperm.xlu1 %1551, %v346_v12   ;;  %1562 = vset.pattern.permute.xlu0 %v1719_v11 }
  0x59   : > { %687 = vperm.xlu0 %1562, %v339_v2  }
  0x5c   : > { %1552 = vset.pattern.permute.xlu1 %v1719_v11 }
  0x5d   : > { %707 = vperm.xlu1 %1552, %v344_v5   ;;  %699 = vperm.xlu0 %1562, %v342_v3  }
  0x61   : > { %711 = vperm.xlu1 %1552, %v345_v15   ;;  %703 = vperm.xlu0 %1562, %v343_v10  }
  0x65   : > { %1553 = vset.pattern.permute.xlu1 %v1716_v0  ;;  %715 = vperm.xlu0 %1562, %v346_v12  }
  0x66   : > { %403 = vperm.xlu1 %1553, %v1813_v13  }
  0x69   : > { %719 = vperm.xlu0 %1562, %v1813_v13  }
  0x6a   : > { %413 = vperm.xlu1 %1553, %v349_v20  }
  0x6d   : > { %731 = vperm.xlu0 %1562, %v1817_v14  }
  0x6e   : > { %418 = vperm.xlu1 %1553, %v1817_v14  }
  0x71   : > { %735 = vperm.xlu0 %1562, %v1823_v16  }
  0x72   : > { %1554 = vset.pattern.permute.xlu1 %v1717_v7 }
  0x73   : > { %521 = vperm.xlu1 %1554, %v1799_v6  }
  0x75   : > { %747 = vperm.xlu0 %1562, %v1827_v17  }
  0x77   : > { %525 = vperm.xlu1 %1554, %v349_v20  }
  0x7b   : > { %1555 = vset.pattern.permute.xlu1 %v1718_v9 }
  0x7c   : > { %618 = vperm.xlu1 %1555, %v1813_v13  }
  0x80   : > { %626 = vperm.xlu1 %1555, %v349_v20  }
  0x84   : > { %630 = vperm.xlu1 %1555, %v1817_v14  }
  0x88   : > { %1556 = vset.pattern.permute.xlu1 %v1719_v11 }
  0x89   : > { %723 = vperm.xlu1 %1556, %v1799_v6  }
  0x8d   : > { %727 = vperm.xlu1 %1556, %v349_v20  }
  0x91   : > { %v374_v27 = vpop.permute.xlu1 %373  ;;  %1557 = vset.pattern.permute.xlu1 %v1716_v0  ;;  %v1877_v28 = vpop.permute.xlu0 %363  ;;  %v1930_v0 = vrot.slane %v359_v57, %v464_v58 }
  0x92   : > { %423 = vperm.xlu1 %1557, %v1823_v16   ;;  %v445_v14 = vmul.f32 %v1920_v59, %v1877_v28 }
  0x94   : > { %v467_v24 = vadd.f32 %v1930_v0, %v445_v14 }
  0x95   : > { %v1881_v30 = vpop.permute.xlu1 %378  ;;  %v369_v31 = vpop.permute.xlu0 %368 }
  0x96   : > { %433 = vperm.xlu1 %1557, %v353_v29   ;;  %v446_v60 = vmul.f32 %v1920_v59, %v369_v31  ;;  %v448_v21 = vmul.f32 %v1920_v59, %v1881_v30 }
  0x98   : > { %v468_v1 = vadd.f32 %v1930_v0, %v446_v60  ;;  %v470_v30 = vadd.f32 %v1930_v0, %v448_v21 }
  0x99   : > { %v1883_v32 = vpop.permute.xlu0 %388 }
  0x9a   : > { %v490_v33 = vpop.permute.xlu1 %489  ;;  %438 = vperm.xlu1 %1557, %v1827_v17   ;;  %v450_v28 = vmul.f32 %v1920_v59, %v1883_v32 }
  0x9b   : > { %v553_v2 = vmul.f32 %v1926_v62, %v490_v33 }
  0x9d   : > { %v1886_v34 = vpop.permute.xlu0 %408 }
  0x9e   : > { %v494_v35 = vpop.permute.xlu1 %493  ;;  %1559 = vset.pattern.permute.xlu1 %v1717_v7  ;;  %v569_v7 = vadd.f32 %v553_v2, %v468_v1 }
  0x9f   : > { %537 = vperm.xlu1 %1559, %v1804_v8   ;;  %v554_v13 = vmul.f32 %v1926_v62, %v494_v35 }
  0xa1   : > { %v1890_v36 = vpop.permute.xlu0 %428 }
  0xa3   : > { %541 = vperm.xlu1 %1559, %v353_v29   ;;  %v1892_v37 = vpop.permute.xlu1 %586 }
  0xa6   : > { %v486_v38 = vpop.permute.xlu0 %485 }
  0xa7   : > { %1561 = vset.pattern.permute.xlu1 %v1718_v9  ;;  %v595_v39 = vpop.permute.xlu1 %594  ;;  %v1944_v9 = vld [vmem:[%s2187_s2 + $0x3] ss:$0 sm:$0xff]  ;;  %v552_v25 = vmul.f32 %v1926_v62, %v486_v38 }
  0xa8   : > { %634 = vperm.xlu1 %1561, %v1823_v16  }
  0xaa   : > { %v498_v40 = vpop.permute.xlu0 %497 }
  0xab   : > { %v1896_v41 = vpop.permute.xlu1 %598 }
  0xac   : > { %642 = vperm.xlu1 %1561, %v353_v29   ;;  %v656_v38 = vmul.f32 %v1937_v4, %v1896_v41 }
  0xae   : > { %v1898_v42 = vpop.permute.xlu0 %501 }
  0xb0   : > { %646 = vperm.xlu1 %1561, %v1827_v17   ;;  %v692_v43 = vpop.permute.xlu1 %691  ;;  %v655_v17 = vmul.f32 %v1937_v4, %v595_v39  ;;  %v568_v39 = vadd.f32 %v552_v25, %v467_v24 }
  0xb1   : > { %v755_v15 = vmul.f32 %v1944_v9, %v692_v43 }
  0xb2   : > { %v1901_v44 = vpop.permute.xlu0 %513 }
  0xb4   : > { %1563 = vset.pattern.permute.xlu1 %v1719_v11  ;;  %v696_v45 = vpop.permute.xlu1 %695 }
  0xb5   : > { %739 = vperm.xlu1 %1563, %v1804_v8   ;;  %v447_v8 = vmul.f32 %v1920_v59, %v374_v27  ;;  %v756_v23 = vmul.f32 %v1944_v9, %v696_v45  ;;  %v555_v27 = vmul.f32 %v1926_v62, %v498_v40  ;;  %v472_v45 = vadd.f32 %v1930_v0, %v450_v28 }
  0xb6   : > { %v1905_v46 = vpop.permute.xlu0 %517  ;;  %v653_v40 = vmul.f32 %v1937_v4, %v1892_v37  ;;  %v556_v37 = vmul.f32 %v1926_v62, %v1898_v42 }
  0xb7   : > { %v469_v16 = vadd.f32 %v1930_v0, %v447_v8  ;;  %v571_v43 = vadd.f32 %v555_v27, %v470_v30 }
  0xb8   : > { %v669_v58 = vadd.f32 %v653_v40, %v568_v39 }
  0xb9   : > { %743 = vperm.xlu1 %1563, %v353_v29   ;;  %v384_v50 = vpop.permute.xlu1 %383  ;;  %v570_v22 = vadd.f32 %v554_v13, %v469_v16  ;;  %v672_v60 = vadd.f32 %v656_v38, %v571_v43  ;;  %v559_v13 = vmul.f32 %v1926_v62, %v1901_v44 }
  0xba   : > { %v1910_v51 = vpop.permute.xlu0 %529  ;;  %v449_v52 = vmul.f32 %v1920_v59, %v384_v50 }
  0xbb   : > { %v671_v26 = vadd.f32 %v655_v17, %v570_v22 }
  0xbd   : > { %v394_v55 = vpop.permute.xlu1 %393  ;;  %v1968_v35 = vadd.f32 %v756_v23, %v671_v26 }
  0xbe   : > { %v1915_v56 = vpop.permute.xlu0 %533  ;;  %v451_v53 = vmul.f32 %v1920_v59, %v394_v55  ;;  %v471_v55 = vadd.f32 %v1930_v0, %v449_v52 }
  0xbf   : > { %v788_v49 = vsub.f32 0.0, %v1968_v35 }
  0xc0   : > { %v572_v23 = vadd.f32 %v556_v37, %v471_v55 }
  0xc1   : > { %v399_v61 = vpop.permute.xlu1 %398  ;;  %v806_v50 = vmul.f32 1.442695, %v788_v49 }
  0xc2   : > { %v1928_v63 = vpop.permute.xlu0 %545  ;;  %v452_v2 = vmul.f32 %v1920_v59, %v399_v61 }
  0xc4   : > { %v474_v16 = vadd.f32 %v1930_v0, %v452_v2 }
  0xc6   : > { %v506_v3 = vpop.permute.xlu1 %505  ;;  %v575_v30 = vadd.f32 %v559_v13, %v474_v16 }
  0xc7   : > { %v591_v5 = vpop.permute.xlu0 %590  ;;  %v557_v32 = vmul.f32 %v1926_v62, %v506_v3 }
  0xc8   : > { %v654_v6 = vmul.f32 %v1937_v4, %v591_v5 }
  0xc9   : > { %v573_v3 = vadd.f32 %v557_v32, %v472_v45 }
  0xca   : > { %v510_v10 = vpop.permute.xlu1 %509  ;;  %v670_v11 = vadd.f32 %v654_v6, %v569_v7  ;;  %v473_v6 = vadd.f32 %v1930_v0, %v451_v53 }
  0xcb   : > { %v607_v12 = vpop.permute.xlu0 %606  ;;  %v558_v1 = vmul.f32 %v1926_v62, %v510_v10 }
  0xcc   : > { %v1954_v20 = vadd.f32 %v755_v15, %v670_v11  ;;  %v658_v57 = vmul.f32 %v1937_v4, %v607_v12 }
  0xcd   : > { %v574_v14 = vadd.f32 %v558_v1, %v473_v6 }
  0xce   : > { %v787_v33 = vsub.f32 0.0, %v1954_v20  ;;  %v674_v12 = vadd.f32 %v658_v57, %v573_v3 }
  0xcf   : > { %v603_v18 = vpop.permute.xlu1 %602  ;;  %v1952_v19 = vpop.permute.xlu0 %622 }
  0xd0   : > { %v804_v48 = vmul.f32 1.442695, %v787_v33  ;;  %v657_v15 = vmul.f32 %v1937_v4, %v603_v18 }
  0xd2   : > { %1580 = vpow2.f32 %v804_v48 }
  0xd3   : > { %v611_v29 = vpop.permute.xlu1 %610  ;;  %v1964_v31 = vpop.permute.xlu0 %638  ;;  %1582 = vpow2.f32 %v806_v50 }
  0xd4   : > { %v659_v7 = vmul.f32 %v1937_v4, %v611_v29  ;;  %v673_v29 = vadd.f32 %v657_v15, %v572_v23 }
  0xd6   : > { %v675_v24 = vadd.f32 %v659_v7, %v574_v14 }
  0xd7   : > { %v615_v47 = vpop.permute.xlu1 %614 }
  0xd8   : > { %v688_v54 = vpop.permute.xlu0 %687  ;;  %v660_v25 = vmul.f32 %v1937_v4, %v615_v47 }
  0xd9   : > { %v754_v41 = vmul.f32 %v1944_v9, %v688_v54 }
  0xda   : > { %v676_v47 = vadd.f32 %v660_v25, %v575_v30  ;;  %v560_v25 = vmul.f32 %v1926_v62, %v1905_v46 }
  0xdb   : > { %v1985_v5 = vadd.f32 %v754_v41, %v669_v58 }
  0xdc   : > { %v708_v8 = vpop.permute.xlu1 %707  ;;  %v700_v11 = vpop.permute.xlu0 %699 }
  0xdd   : > { %v786_v42 = vsub.f32 0.0, %v1985_v5  ;;  %v759_v10 = vmul.f32 %v1944_v9, %v708_v8  ;;  %v757_v61 = vmul.f32 %v1944_v9, %v700_v11  ;;  %v1581_v32 = vpop.eup %1580 }
  0xde   : > { %v835_v41 = vadd.f32 1.0, %v1581_v32  ;;  %v1583_v1 = vpop.eup %1582 }
  0xdf   : > { %v802_v17 = vmul.f32 1.442695, %v786_v42  ;;  %v1997_v21 = vadd.f32 %v759_v10, %v674_v12  ;;  %v1999_v22 = vadd.f32 %v757_v61, %v672_v60  ;;  %v836_v55 = vadd.f32 1.0, %v1583_v1 }
  0xe0   : > { %v712_v26 = vpop.permute.xlu1 %711  ;;  %v704_v27 = vpop.permute.xlu0 %703 }
  0xe1   : > { %1584 = vpow2.f32 %v802_v17  ;;  %v791_v44 = vsub.f32 0.0, %v1997_v21  ;;  %v789_v28 = vsub.f32 0.0, %v1999_v22  ;;  %v760_v18 = vmul.f32 %v1944_v9, %v712_v26 }
  0xe2   : > { %v758_v33 = vmul.f32 %v1944_v9, %v704_v27 }
  0xe3   : > { %v812_v39 = vmul.f32 1.442695, %v791_v44  ;;  %v808_v43 = vmul.f32 1.442695, %v789_v28  ;;  %v2006_v38 = vadd.f32 %v760_v18, %v675_v24 }
  0xe4   : > { %v2008_v45 = vadd.f32 %v758_v33, %v673_v29  ;;  %v716_v40 = vpop.permute.xlu0 %715 }
  0xe5   : > { %1586 = vpow2.f32 %v812_v39  ;;  %v792_v48 = vsub.f32 0.0, %v2006_v38  ;;  %v761_v49 = vmul.f32 %v1944_v9, %v716_v40  ;;  %v404_v52 = vpop.permute.xlu1 %403 }
  0xe6   : > { %1588 = vpow2.f32 %v808_v43  ;;  %v790_v53 = vsub.f32 0.0, %v2008_v45  ;;  %v453_v14 = vmul.f32 %v1920_v59, %v404_v52 }
  0xe7   : > { %v814_v54 = vmul.f32 1.442695, %v792_v48  ;;  %v2013_v57 = vadd.f32 %v761_v49, %v676_v47  ;;  %v454_v49 = vmul.f32 %v1920_v59, %v1886_v34 }
  0xe8   : > { %v810_v58 = vmul.f32 1.442695, %v790_v53  ;;  %v475_v27 = vadd.f32 %v1930_v0, %v453_v14  ;;  %v720_v18 = vpop.permute.xlu0 %719 }
  0xe9   : > { %1590 = vpow2.f32 %v814_v54  ;;  %v793_v60 = vsub.f32 0.0, %v2013_v57  ;;  %v2016_v37 = vpop.permute.xlu1 %413  ;;  %v762_v46 = vmul.f32 %v1944_v9, %v720_v18  ;;  %v476_v34 = vadd.f32 %v1930_v0, %v454_v49 }
  0xea   : > { %1592 = vpow2.f32 %v810_v58  ;;  %v576_v43 = vadd.f32 %v560_v25, %v475_v27 }
  0xeb   : > { %v1585_v2 = vpop.eup %1584  ;;  %v816_v3 = vmul.f32 1.442695, %v793_v60  ;;  %1594 = vrcp.f32 %v835_v41 }
  0xec   : > { %v834_v50 = vadd.f32 1.0, %v1585_v2  ;;  %v732_v1 = vpop.permute.xlu0 %731 }
  0xed   : > { %1596 = vpow2.f32 %v816_v3  ;;  %v419_v6 = vpop.permute.xlu1 %418 }
  0xee   : > { %1598 = vrcp.f32 %v834_v50  ;;  %v456_v39 = vmul.f32 %v1920_v59, %v419_v6  ;;  %v662_v50 = vmul.f32 %v1937_v4, %v1952_v19 }
  0xef   : > { %v1587_v7 = vpop.eup %1586  ;;  %1600 = vrcp.f32 %v836_v55 }
  0xf0   : > { %v1589_v8 = vpop.eup %1588  ;;  %v839_v11 = vadd.f32 1.0, %v1587_v7  ;;  %v478_v53 = vadd.f32 %v1930_v0, %v456_v39 }
  0xf1   : > { %v837_v12 = vadd.f32 1.0, %v1589_v8 }
  0xf2   : > { %v522_v42 = vpop.permute.xlu1 %521 }
  0xf3   : > { %v1591_v10 = vpop.eup %1590  ;;  %1602 = vrcp.f32 %v837_v12  ;;  %v561_v60 = vmul.f32 %v1926_v62, %v522_v42  ;;  %v455_v42 = vmul.f32 %v1920_v59, %v2016_v37 }
  0xf4   : > { %v1593_v61 = vpop.eup %1592  ;;  %v840_v13 = vadd.f32 1.0, %v1591_v10  ;;  %1604 = vrcp.f32 %v839_v11 }
  0xf5   : > { %v838_v15 = vadd.f32 1.0, %v1593_v61  ;;  %v1595_v16 = vpop.eup %1594  ;;  %v577_v10 = vadd.f32 %v561_v60, %v476_v34 }
  0xf6   : > { %v526_v17 = vpop.permute.xlu1 %525  ;;  %v867_v28 = vmul.f32 %v1595_v16, %v1954_v20 }
  0xf7   : > { %v1597_v23 = vpop.eup %1596  ;;  %1606 = vrcp.f32 %v838_v15  ;;  %v562_v19 = vmul.f32 %v1926_v62, %v526_v17 }
  0xf8   : > { %v1599_v24 = vpop.eup %1598  ;;  %1608 = vrcp.f32 %v840_v13  ;;  %v841_v26 = vadd.f32 1.0, %v1597_v23  ;;  %v477_v23 = vadd.f32 %v1930_v0, %v455_v42 }
  0xf9   : > { %v866_v44 = vmul.f32 %v1599_v24, %v1985_v5  ;;  %v1601_v29 = vpop.eup %1600 }
  0xfa   : > { %1610 = vrcp.f32 %v841_v26  ;;  %v868_v47 = vmul.f32 %v1601_v29, %v1968_v35  ;;  %v563_v35 = vmul.f32 %v1926_v62, %v1910_v51  ;;  %v765_v51 = vmul.f32 %v1944_v9, %v732_v1 }
  0xfb   : > { %v619_v33 = vpop.permute.xlu1 %618  ;;  %v882_v30 = vpack.c.bf16 %v867_v28, %v866_v44  ;;  %v578_v37 = vadd.f32 %v562_v19, %v477_v23 }
  0xfc   : > { %v661_v40 = vmul.f32 %v1937_v4, %v619_v33  ;;  %v579_v8 = vadd.f32 %v563_v35, %v478_v53  ;;  %v666_v35 = vmul.f32 %v1937_v4, %v1964_v31 }
  0xfd   : > { %v1603_v32 = vpop.eup %1602  ;;  %1484 = vmatprep.mubr.bf16.mxu0 %v882_v30 }
  0xfe   : > { %v869_v5 = vmul.f32 %v1603_v32, %v1999_v22  ;;  %v677_v48 = vadd.f32 %v661_v40, %v576_v43  ;;  %v1605_v20 = vpop.eup %1604 }
  0xff   : > { %v627_v52 = vpop.permute.xlu1 %626  ;;  %v871_v22 = vmul.f32 %v1605_v20, %v1997_v21  ;;  %v458_v20 = vmul.f32 %v1920_v59, %v1890_v36 }
 0x100   : > { %v2032_v54 = vadd.f32 %v762_v46, %v677_v48  ;;  %v883_v58 = vpack.c.bf16 %v869_v5, %v868_v47  ;;  %v663_v24 = vmul.f32 %v1937_v4, %v627_v52 }
 0x101   : > { %v1607_v41 = vpop.eup %1606 }
 0x102   : > { %v1609_v2 = vpop.eup %1608  ;;  %v870_v3 = vmul.f32 %v1607_v41, %v2008_v45  ;;  %1485 = vmatmul.mubr.bf16.vlgmr.msra.gmra.mrb[0].mxu0 %v883_v58  ;;  %v794_v55 = vsub.f32 0.0, %v2032_v54  ;;  %v679_v44 = vadd.f32 %v663_v24, %v578_v37  ;;  %v480_v41 = vadd.f32 %v1930_v0, %v458_v20 }
 0x103   : > { %v631_v6 = vpop.permute.xlu1 %630  ;;  %v872_v21 = vmul.f32 %v1609_v2, %v2006_v38  ;;  %v678_v38 = vadd.f32 %v662_v50, %v577_v10  ;;  %v567_v24 = vmul.f32 %v1926_v62, %v1928_v63 }
 0x104   : > { %v1611_v7 = vpop.eup %1610  ;;  %v664_v11 = vmul.f32 %v1937_v4, %v631_v6  ;;  %v884_v12 = vpack.c.bf16 %v871_v22, %v870_v3  ;;  %v818_v13 = vmul.f32 1.442695, %v794_v55  ;;  %v564_v55 = vmul.f32 %v1926_v62, %v1915_v56 }
 0x105   : > { %v873_v45 = vmul.f32 %v1611_v7, %v2013_v57 }
 0x106   : > { %v680_v61 = vadd.f32 %v664_v11, %v579_v8  ;;  %1488 = vmatprep.mubr.bf16.mxu0 %v884_v12  ;;  %1612 = vpow2.f32 %v818_v13 }
 0x107   : > { %v885_v14 = vpack.c.bf16 %v873_v45, %v872_v21  ;;  %v736_v21 = vpop.permute.xlu0 %735 }
 0x108   : > { %v2050_v15 = vadd.f32 %v765_v51, %v680_v61  ;;  %v724_v16 = vpop.permute.xlu1 %723  ;;  %v766_v42 = vmul.f32 %v1944_v9, %v736_v21  ;;  %v1578_v21 = vld [vmem:[%s2192_s7 + $0x30] sm:$0xff]  }
 0x109   : > { %v763_v57 = vmul.f32 %v1944_v9, %v724_v16 }
 0x10a   : > { %v797_v25 = vsub.f32 0.0, %v2050_v15  ;;  %1489 = vmatmul.mubr.bf16.gmra.mrb[4].mxu0 %v885_v14 }
 0x10b   : > { %v779_v26 = vadd.f32 %v763_v57, %v678_v38 }
 0x10c   : > { %v824_v27 = vmul.f32 1.442695, %v797_v25  ;;  %v728_v17 = vpop.permute.xlu1 %727 }
 0x10d   : > { %v795_v28 = vsub.f32 0.0, %v779_v26  ;;  %v764_v18 = vmul.f32 %v1944_v9, %v728_v17 }
 0x10e   : > { %1614 = vpow2.f32 %v824_v27 }
 0x10f   : > { %v820_v29 = vmul.f32 1.442695, %v795_v28  ;;  %v780_v33 = vadd.f32 %v764_v18, %v679_v44 }
 0x110   : > { %v1613_v40 = vpop.eup %1612 }
 0x111   : > { %1616 = vpow2.f32 %v820_v29  ;;  %v796_v30 = vsub.f32 0.0, %v780_v33  ;;  %v424_v39 = vpop.permute.xlu1 %423  ;;  %v842_v32 = vadd.f32 1.0, %v1613_v40 }
 0x112   : > { %v457_v2 = vmul.f32 %v1920_v59, %v424_v39 }
 0x113   : > { %v822_v43 = vmul.f32 1.442695, %v796_v30 }
 0x114   : > { %v479_v34 = vadd.f32 %v1930_v0, %v457_v2 }
 0x115   : > { %1618 = vpow2.f32 %v822_v43  ;;  %v434_v46 = vpop.permute.xlu1 %433 }
 0x116   : > { %1620 = vrcp.f32 %v842_v32  ;;  %v580_v11 = vadd.f32 %v564_v55, %v479_v34  ;;  %v459_v27 = vmul.f32 %v1920_v59, %v434_v46 }
 0x118   : > { %v1615_v47 = vpop.eup %1614  ;;  %v481_v63 = vadd.f32 %v1930_v0, %v459_v27 }
 0x119   : > { %v439_v5 = vpop.permute.xlu1 %438  ;;  %v845_v49 = vadd.f32 1.0, %v1615_v47 }
 0x11a   : > { %v460_v8 = vmul.f32 %v1920_v59, %v439_v5 }
 0x11b   : > { %v1617_v48 = vpop.eup %1616 }
 0x11c   : > { %v843_v52 = vadd.f32 1.0, %v1617_v48  ;;  %v482_v56 = vadd.f32 %v1930_v0, %v460_v8  ;;  %v1573_v8 = vld [vmem:[%s2192_s7 + $0x8] sm:$0xff]  }
 0x11e   : > { %1622 = vrcp.f32 %v843_v52  ;;  %v538_v53 = vpop.permute.xlu1 %537  ;;  %v583_v37 = vadd.f32 %v567_v24, %v482_v56 }
 0x11f   : > { %v1619_v58 = vpop.eup %1618  ;;  %v565_v60 = vmul.f32 %v1926_v62, %v538_v53  ;;  %1624 = vrcp.f32 %v845_v49 }
 0x120   : > { %v844_v1 = vadd.f32 1.0, %v1619_v58  ;;  %v1621_v50 = vpop.eup %1620 }
 0x121   : > { %v581_v22 = vadd.f32 %v565_v60, %v480_v41  ;;  %v874_v51 = vmul.f32 %v1621_v50, %v2032_v54  ;;  %v748_v54 = vpop.permute.xlu0 %747 }
 0x122   : > { %1626 = vrcp.f32 %v844_v1  ;;  %v542_v36 = vpop.permute.xlu1 %541  ;;  %v769_v17 = vmul.f32 %v1944_v9, %v748_v54 }
 0x123   : > { %v682_v3 = vadd.f32 %v666_v35, %v581_v22 }
 0x127   : > { %v635_v6 = vpop.permute.xlu1 %634 }
 0x128   : > { %v1623_v7 = vpop.eup %1622  ;;  %v665_v12 = vmul.f32 %v1937_v4, %v635_v6  ;;  %v1572_v6 = vld [vmem:[%s2192_s7] sm:$0xff]  }
 0x129   : > { %v875_v31 = vmul.f32 %v1623_v7, %v779_v26  ;;  %v1625_v45 = vpop.eup %1624  ;;  %1500 = vmatprep.subr.bf16.mxu1 %v1572_v6 }
 0x12a   : > { %v681_v10 = vadd.f32 %v665_v12, %v580_v11  ;;  %v877_v16 = vmul.f32 %v1625_v45, %v2050_v15  ;;  %v566_v15 = vmul.f32 %v1926_v62, %v542_v36  ;;  %1501 = vmatpush3.bf16.msra.mxu1 %v1572_v6  ;;  %v1574_v11 = vld [vmem:[%s2192_s7 + $0x10] sm:$0xff]   ;;  %v1575_v12 = vld [vmem:[%s2192_s7 + $0x18] sm:$0xff]  }
 0x12b   : > { %v643_v61 = vpop.permute.xlu1 %642  ;;  %v886_v19 = vpack.c.bf16 %v875_v31, %v874_v51  ;;  %1502 = vmatprep.subr.bf16.mxu1 %v1573_v8  ;;  %v1576_v51 = vld [vmem:[%s2192_s7 + $0x20] sm:$0xff]   ;;  %v1577_v31 = vld [vmem:[%s2192_s7 + $0x28] sm:$0xff]   ;;  %v1579_v45 = vld [vmem:[%s2192_s7 + $0x38] sm:$0xff]  }
 0x12c   : > { %v1627_v13 = vpop.eup %1626  ;;  %v782_v14 = vadd.f32 %v766_v42, %v681_v10  ;;  %v582_v43 = vadd.f32 %v566_v15, %v481_v63  ;;  %v2110_v42 = vld [vmem:[%s2191_s6] ss:$0 sm:$0xff] }
 0x12d   : > { %v876_v23 = vmul.f32 %v1627_v13, %v780_v33  ;;  %1492 = vmatprep.mubr.bf16.mxu0 %v886_v19  ;;  %v667_v33 = vmul.f32 %v1937_v4, %v643_v61 }
 0x12e   : > { %v798_v38 = vsub.f32 0.0, %v782_v14  ;;  %1503 = vmatpush3.bf16.msra.mxu1 %v1573_v8 }
 0x12f   : > { %v647_v57 = vpop.permute.xlu1 %646  ;;  %v887_v25 = vpack.c.bf16 %v877_v16, %v876_v23  ;;  %v683_v32 = vadd.f32 %v667_v33, %v582_v43  ;;  %1504 = vmatprep.subr.bf16.mxu1 %v1574_v11 }
 0x130   : > { %v668_v26 = vmul.f32 %v1937_v4, %v647_v57  ;;  %v826_v28 = vmul.f32 1.442695, %v798_v38 }
 0x131   : > { %1493 = vmatmul.mubr.bf16.gmra.mrb[8].mxu0 %v887_v25 }
 0x132   : > { %v684_v44 = vadd.f32 %v668_v26, %v583_v37  ;;  %1628 = vpow2.f32 %v826_v28  ;;  %1505 = vmatpush3.bf16.msra.mxu1 %v1574_v11 }
 0x133   : > { %1506 = vmatprep.subr.bf16.mxu1 %v1575_v12 }
 0x134   : > { %v785_v18 = vadd.f32 %v769_v17, %v684_v44  ;;  %v740_v29 = vpop.permute.xlu1 %739 }
 0x135   : > { %v767_v30 = vmul.f32 %v1944_v9, %v740_v29 }
 0x136   : > { %v801_v39 = vsub.f32 0.0, %v785_v18  ;;  %1507 = vmatpush3.bf16.msra.mxu1 %v1575_v12 }
 0x137   : > { %v783_v40 = vadd.f32 %v767_v30, %v682_v3  ;;  %1508 = vmatprep.subr.bf16.mxu1 %v1576_v51 }
 0x138   : > { %v832_v59 = vmul.f32 1.442695, %v801_v39  ;;  %v744_v46 = vpop.permute.xlu1 %743 }
 0x139   : > { %v799_v47 = vsub.f32 0.0, %v783_v40  ;;  %v768_v5 = vmul.f32 %v1944_v9, %v744_v46 }
 0x13a   : > { %1630 = vpow2.f32 %v832_v59  ;;  %1509 = vmatpush3.bf16.msra.mxu1 %v1576_v51 }
 0x13b   : > { %v828_v62 = vmul.f32 1.442695, %v799_v47  ;;  %v784_v48 = vadd.f32 %v768_v5, %v683_v32  ;;  %1510 = vmatprep.subr.bf16.mxu1 %v1577_v31 }
 0x13c   : > { %v1629_v49 = vpop.eup %1628 }
 0x13d   : > { %1632 = vpow2.f32 %v828_v62  ;;  %v800_v20 = vsub.f32 0.0, %v784_v48  ;;  %v846_v4 = vadd.f32 1.0, %v1629_v49 }
 0x13e   : > { %1511 = vmatpush3.bf16.msra.mxu1 %v1577_v31 }
 0x13f   : > { %v830_v0 = vmul.f32 1.442695, %v800_v20  ;;  %1512 = vmatprep.subr.bf16.mxu1 %v1578_v21 }
 0x141   : > { %1634 = vpow2.f32 %v830_v0 }
 0x142   : > { %1636 = vrcp.f32 %v846_v4  ;;  %1513 = vmatpush3.bf16.msra.mxu1 %v1578_v21 }
 0x143   : > { %1514 = vmatprep.subr.bf16.mxu1 %v1579_v45 }
 0x144   : > { %v1631_v52 = vpop.eup %1630 }
 0x145   : > { %v849_v58 = vadd.f32 1.0, %v1631_v52 }
 0x146   : > { %1515 = vmatpush3.bf16.msra.mxu1 %v1579_v45 }
 0x147   : > { %v1633_v53 = vpop.eup %1632 }
 0x148   : > { %v847_v41 = vadd.f32 1.0, %v1633_v53 }
 0x14a   : > { %1638 = vrcp.f32 %v847_v41 }
 0x14b   : > { %v1635_v60 = vpop.eup %1634  ;;  %1640 = vrcp.f32 %v849_v58 }
 0x14c   : > { %v848_v1 = vadd.f32 1.0, %v1635_v60  ;;  %v1637_v9 = vpop.eup %1636 }
 0x14d   : > { %v878_v22 = vmul.f32 %v1637_v9, %v782_v14 }
 0x14e   : > { %1642 = vrcp.f32 %v848_v1 }
 0x154   : > { %v1639_v2 = vpop.eup %1638 }
 0x155   : > { %v879_v35 = vmul.f32 %v1639_v2, %v783_v40  ;;  %v1641_v36 = vpop.eup %1640 }
 0x156   : > { %v881_v55 = vmul.f32 %v1641_v36, %v785_v18 }
 0x157   : > { %v888_v3 = vpack.c.bf16 %v879_v35, %v878_v22 }
 0x158   : > { %v1643_v34 = vpop.eup %1642 }
 0x159   : > { %v880_v50 = vmul.f32 %v1643_v34, %v784_v48  ;;  %1496 = vmatprep.mubr.bf16.mxu0 %v888_v3 }
 0x15b   : > { %v889_v7 = vpack.c.bf16 %v881_v55, %v880_v50 }
 0x15d   : > { %1497 = vmatmul.mubr.bf16.gmra.mrb[12].mxu0 %v889_v7 }
 0x1d5   : > { %v1486_v10 = vpop.f32.mrb[0].mxu0 }
 0x1d6   : > { %v2113_v61 = vadd.f32 %v1486_v10, %v2110_v42  ;;  %v995_v19 = vpop.f32.mrb[1].mxu0 }
 0x1d7   : > { %v2116_v13 = vadd.f32 %v2110_v42, %v995_v19  ;;  %v1487_v56 = vpop.f32.mrb[2].mxu0 }
 0x1d8   : > { %v1060_v14 = vsub.f32 0.0, %v2113_v61  ;;  %v2120_v16 = vadd.f32 %v1487_v56, %v2110_v42  ;;  %v998_v23 = vpop.f32.mrb[3].mxu0 }
 0x1d9   : > { %v1058_v24 = vsub.f32 0.0, %v2116_v13  ;;  %v999_v54 = vadd.f32 %v2110_v42, %v998_v23 }
 0x1da   : > { %v1078_v38 = vmul.f32 1.442695, %v1060_v14  ;;  %v1061_v57 = vsub.f32 0.0, %v2120_v16 }
 0x1db   : > { %v1074_v25 = vmul.f32 1.442695, %v1058_v24  ;;  %v1059_v37 = vsub.f32 0.0, %v999_v54 }
 0x1dc   : > { %1644 = vpow2.f32 %v1078_v38  ;;  %v1080_v26 = vmul.f32 1.442695, %v1061_v57 }
 0x1dd   : > { %1646 = vpow2.f32 %v1074_v25  ;;  %v1076_v27 = vmul.f32 1.442695, %v1059_v37  ;;  %v1490_v17 = vpop.f32.mrb[4].mxu0 }
 0x1de   : > { %1648 = vpow2.f32 %v1080_v26  ;;  %v1020_v44 = vadd.f32 %v1490_v17, %v2110_v42  ;;  %v1011_v15 = vpop.f32.mrb[5].mxu0 }
 0x1df   : > { %1650 = vpow2.f32 %v1076_v27  ;;  %v1012_v28 = vadd.f32 %v2110_v42, %v1011_v15  ;;  %v1491_v18 = vpop.f32.mrb[6].mxu0 }
 0x1e0   : > { %v1064_v29 = vsub.f32 0.0, %v1020_v44  ;;  %v1023_v63 = vadd.f32 %v1491_v18, %v2110_v42  ;;  %v1014_v33 = vpop.f32.mrb[7].mxu0 }
 0x1e1   : > { %v1062_v30 = vsub.f32 0.0, %v1012_v28  ;;  %v1015_v39 = vadd.f32 %v2110_v42, %v1014_v33 }
 0x1e2   : > { %v1086_v43 = vmul.f32 1.442695, %v1064_v29  ;;  %v1065_v40 = vsub.f32 0.0, %v1023_v63 }
 0x1e3   : > { %v1082_v59 = vmul.f32 1.442695, %v1062_v30  ;;  %v1063_v46 = vsub.f32 0.0, %v1015_v39 }
 0x1e4   : > { %1652 = vpow2.f32 %v1086_v43  ;;  %v1088_v32 = vmul.f32 1.442695, %v1065_v40 }
 0x1e5   : > { %1654 = vpow2.f32 %v1082_v59  ;;  %v1084_v47 = vmul.f32 1.442695, %v1063_v46 }
 0x1e6   : > { %v1645_v5 = vpop.eup %1644  ;;  %1656 = vpow2.f32 %v1088_v32 }
 0x1e7   : > { %v1647_v62 = vpop.eup %1646  ;;  %v1108_v48 = vadd.f32 1.0, %v1645_v5  ;;  %1658 = vpow2.f32 %v1084_v47 }
 0x1e8   : > { %v1649_v20 = vpop.eup %1648  ;;  %v1106_v0 = vadd.f32 1.0, %v1647_v62 }
 0x1e9   : > { %v1651_v49 = vpop.eup %1650  ;;  %1660 = vrcp.f32 %v1108_v48  ;;  %v1109_v4 = vadd.f32 1.0, %v1649_v20 }
 0x1ea   : > { %1662 = vrcp.f32 %v1106_v0  ;;  %v1107_v52 = vadd.f32 1.0, %v1651_v49 }
 0x1eb   : > { %1664 = vrcp.f32 %v1109_v4 }
 0x1ec   : > { %1666 = vrcp.f32 %v1107_v52 }
 0x1ee   : > { %v1653_v53 = vpop.eup %1652 }
 0x1ef   : > { %v1655_v58 = vpop.eup %1654  ;;  %v1112_v41 = vadd.f32 1.0, %v1653_v53 }
 0x1f0   : > { %v1657_v60 = vpop.eup %1656  ;;  %v1110_v1 = vadd.f32 1.0, %v1655_v58 }
 0x1f1   : > { %v1659_v9 = vpop.eup %1658  ;;  %1668 = vrcp.f32 %v1112_v41  ;;  %v1113_v2 = vadd.f32 1.0, %v1657_v60 }
 0x1f2   : > { %1670 = vrcp.f32 %v1110_v1  ;;  %v1111_v35 = vadd.f32 1.0, %v1659_v9 }
 0x1f3   : > { %v1661_v22 = vpop.eup %1660  ;;  %1672 = vrcp.f32 %v1113_v2 }
 0x1f4   : > { %v1663_v36 = vpop.eup %1662  ;;  %1674 = vrcp.f32 %v1111_v35  ;;  %v1140_v50 = vmul.f32 %v1661_v22, %v2113_v61 }
 0x1f5   : > { %v1665_v3 = vpop.eup %1664  ;;  %v1138_v6 = vmul.f32 %v1663_v36, %v2116_v13 }
 0x1f6   : > { %v1667_v34 = vpop.eup %1666  ;;  %v1141_v55 = vmul.f32 %v1665_v3, %v2120_v16 }
 0x1f7   : > { %v1139_v7 = vmul.f32 %v1667_v34, %v999_v54 }
 0x1f8   : > { %v1155_v8 = vpack.c.bf16 %v1141_v55, %v1140_v50 }
 0x1f9   : > { %v1154_v11 = vpack.c.bf16 %v1139_v7, %v1138_v6 }
 0x1fb   : > { %v1669_v12 = vpop.eup %1668  ;;  %1516 = vmatprep.mubr.bf16.mxu1 %v1154_v11 }
 0x1fc   : > { %v1671_v51 = vpop.eup %1670  ;;  %1517 = vmatmul.mubr.bf16.vlgmr.msra.gmra.mrb[0].mxu1 %v1155_v8  ;;  %v1144_v45 = vmul.f32 %v1669_v12, %v1020_v44 }
 0x1fd   : > { %v1673_v31 = vpop.eup %1672  ;;  %v1142_v19 = vmul.f32 %v1671_v51, %v1012_v28 }
 0x1fe   : > { %v1675_v21 = vpop.eup %1674  ;;  %v1145_v10 = vmul.f32 %v1673_v31, %v1023_v63 }
 0x1ff   : > { %v1143_v56 = vmul.f32 %v1675_v21, %v1015_v39 }
 0x200   : > { %v1157_v14 = vpack.c.bf16 %v1145_v10, %v1144_v45 }
 0x201   : > { %v1156_v23 = vpack.c.bf16 %v1143_v56, %v1142_v19 }
 0x203   : > { %1520 = vmatprep.mubr.bf16.mxu1 %v1156_v23 }
 0x204   : > { %1521 = vmatmul.mubr.bf16.gmra.mrb[4].mxu1 %v1157_v14  ;;  %v1494_v61 = vpop.f32.mrb[8].mxu0 }
 0x205   : > { %v1036_v13 = vadd.f32 %v1494_v61, %v2110_v42  ;;  %v1027_v16 = vpop.f32.mrb[9].mxu0 }
 0x206   : > { %v1028_v24 = vadd.f32 %v2110_v42, %v1027_v16  ;;  %v1495_v54 = vpop.f32.mrb[10].mxu0 }
 0x207   : > { %v1068_v38 = vsub.f32 0.0, %v1036_v13  ;;  %v1039_v57 = vadd.f32 %v1495_v54, %v2110_v42  ;;  %v1030_v25 = vpop.f32.mrb[11].mxu0  ;;  %v1425_v54 = vld [vmem:[%s2193_s8] ss:$0 sm:$0xff] }
 0x208   : > { %v1066_v37 = vsub.f32 0.0, %v1028_v24  ;;  %v1031_v26 = vadd.f32 %v2110_v42, %v1030_v25 }
 0x209   : > { %v1094_v27 = vmul.f32 1.442695, %v1068_v38  ;;  %v1069_v17 = vsub.f32 0.0, %v1039_v57 }
 0x20a   : > { %v1090_v44 = vmul.f32 1.442695, %v1066_v37  ;;  %v1067_v15 = vsub.f32 0.0, %v1031_v26 }
 0x20b   : > { %1676 = vpow2.f32 %v1094_v27  ;;  %v1096_v28 = vmul.f32 1.442695, %v1069_v17 }
 0x20c   : > { %1678 = vpow2.f32 %v1090_v44  ;;  %v1092_v18 = vmul.f32 1.442695, %v1067_v15 }
 0x20d   : > { %1680 = vpow2.f32 %v1096_v28 }
 0x20e   : > { %1682 = vpow2.f32 %v1092_v18 }
 0x215   : > { %v1677_v29 = vpop.eup %1676 }
 0x216   : > { %v1679_v63 = vpop.eup %1678  ;;  %v1116_v33 = vadd.f32 1.0, %v1677_v29 }
 0x217   : > { %v1681_v30 = vpop.eup %1680  ;;  %v1114_v39 = vadd.f32 1.0, %v1679_v63 }
 0x218   : > { %v1683_v43 = vpop.eup %1682  ;;  %1684 = vrcp.f32 %v1116_v33  ;;  %v1117_v40 = vadd.f32 1.0, %v1681_v30 }
 0x219   : > { %1686 = vrcp.f32 %v1114_v39  ;;  %v1115_v59 = vadd.f32 1.0, %v1683_v43 }
 0x21a   : > { %1688 = vrcp.f32 %v1117_v40 }
 0x21b   : > { %1690 = vrcp.f32 %v1115_v59 }
 0x222   : > { %v1685_v46 = vpop.eup %1684 }
 0x223   : > { %v1687_v32 = vpop.eup %1686  ;;  %v1148_v62 = vmul.f32 %v1685_v46, %v1036_v13 }
 0x224   : > { %v1689_v47 = vpop.eup %1688  ;;  %v1146_v20 = vmul.f32 %v1687_v32, %v1028_v24 }
 0x225   : > { %v1691_v5 = vpop.eup %1690  ;;  %v1149_v48 = vmul.f32 %v1689_v47, %v1039_v57 }
 0x226   : > { %v1147_v0 = vmul.f32 %v1691_v5, %v1031_v26 }
 0x227   : > { %v1159_v49 = vpack.c.bf16 %v1149_v48, %v1148_v62 }
 0x228   : > { %v1158_v4 = vpack.c.bf16 %v1147_v0, %v1146_v20 }
 0x22a   : > { %1524 = vmatprep.mubr.bf16.mxu1 %v1158_v4 }
 0x22b   : > { %1525 = vmatmul.mubr.bf16.gmra.mrb[8].mxu1 %v1159_v49 }
 0x230   : > { %v1498_v52 = vpop.f32.mrb[12].mxu0 }
 0x231   : > { %v1052_v53 = vadd.f32 %v1498_v52, %v2110_v42  ;;  %v1043_v58 = vpop.f32.mrb[13].mxu0 }
 0x232   : > { %v1044_v41 = vadd.f32 %v2110_v42, %v1043_v58  ;;  %v1499_v60 = vpop.f32.mrb[14].mxu0 }
 0x233   : > { %v1072_v1 = vsub.f32 0.0, %v1052_v53  ;;  %v1055_v9 = vadd.f32 %v1499_v60, %v2110_v42  ;;  %v1046_v2 = vpop.f32.mrb[15].mxu0 }
 0x234   : > { %v1070_v35 = vsub.f32 0.0, %v1044_v41  ;;  %v1047_v22 = vadd.f32 %v2110_v42, %v1046_v2 }
 0x235   : > { %v1102_v36 = vmul.f32 1.442695, %v1072_v1  ;;  %v1073_v3 = vsub.f32 0.0, %v1055_v9 }
 0x236   : > { %v1098_v34 = vmul.f32 1.442695, %v1070_v35  ;;  %v1071_v50 = vsub.f32 0.0, %v1047_v22 }
 0x237   : > { %1692 = vpow2.f32 %v1102_v36  ;;  %v1104_v55 = vmul.f32 1.442695, %v1073_v3 }
 0x238   : > { %1694 = vpow2.f32 %v1098_v34  ;;  %v1100_v6 = vmul.f32 1.442695, %v1071_v50 }
 0x239   : > { %1696 = vpow2.f32 %v1104_v55 }
 0x23a   : > { %1698 = vpow2.f32 %v1100_v6 }
 0x241   : > { %v1693_v7 = vpop.eup %1692 }
 0x242   : > { %v1695_v8 = vpop.eup %1694  ;;  %v1120_v11 = vadd.f32 1.0, %v1693_v7 }
 0x243   : > { %v1697_v12 = vpop.eup %1696  ;;  %v1118_v51 = vadd.f32 1.0, %v1695_v8 }
 0x244   : > { %v1699_v31 = vpop.eup %1698  ;;  %1700 = vrcp.f32 %v1120_v11  ;;  %v1121_v21 = vadd.f32 1.0, %v1697_v12 }
 0x245   : > { %1702 = vrcp.f32 %v1118_v51  ;;  %v1119_v42 = vadd.f32 1.0, %v1699_v31 }
 0x246   : > { %1704 = vrcp.f32 %v1121_v21 }
 0x247   : > { %1706 = vrcp.f32 %v1119_v42 }
 0x24e   : > { %v1701_v45 = vpop.eup %1700 }
 0x24f   : > { %v1703_v10 = vpop.eup %1702  ;;  %v1152_v14 = vmul.f32 %v1701_v45, %v1052_v53 }
 0x250   : > { %v1705_v19 = vpop.eup %1704  ;;  %v1150_v61 = vmul.f32 %v1703_v10, %v1044_v41 }
 0x251   : > { %v1707_v56 = vpop.eup %1706  ;;  %v1153_v23 = vmul.f32 %v1705_v19, %v1055_v9 }
 0x252   : > { %v1151_v13 = vmul.f32 %v1707_v56, %v1047_v22 }
 0x253   : > { %v1161_v16 = vpack.c.bf16 %v1153_v23, %v1152_v14 }
 0x254   : > { %v1160_v24 = vpack.c.bf16 %v1151_v13, %v1150_v61 }
 0x256   : > { %1528 = vmatprep.mubr.bf16.mxu1 %v1160_v24 }
 0x257   : > { %1529 = vmatmul.mubr.bf16.gmra.mrb[12].mxu1 %v1161_v16 }
 0x2cf   : > { %v1518_v38 = vpop.f32.mrb[0].mxu1 }
 0x2d0   : > { %v1276_v57 = vadd.f32 %v1518_v38, %v1425_v54  ;;  %v1267_v25 = vpop.f32.mrb[1].mxu1 }
 0x2d1   : > { %v1268_v37 = vadd.f32 %v1425_v54, %v1267_v25  ;;  %v1519_v26 = vpop.f32.mrb[2].mxu1 }
 0x2d2   : > { %1333 = vst.msk [vmem:[%s2148_s30 + $0x10] sm:$0xff] %vm1330_vm0, %v1276_v57  ;;  %v1279_v27 = vadd.f32 %v1519_v26, %v1425_v54  ;;  %v1270_v17 = vpop.f32.mrb[3].mxu1 }
 0x2d3   : > { %1331 = vst.msk [vmem:[%s2148_s30] sm:$0xff] %vm1330_vm0, %v1268_v37  ;;  %v1271_v44 = vadd.f32 %v1425_v54, %v1270_v17 }
 0x2d4   : > { %1334 = vst.msk [vmem:[%s2148_s30 + $0x18] sm:$0xff] %vm1330_vm0, %v1279_v27 }
 0x2d5   : > { %1332 = vst.msk [vmem:[%s2148_s30 + $0x8] sm:$0xff] %vm1330_vm0, %v1271_v44 }
 0x2d7   : > { %v1522_v15 = vpop.f32.mrb[4].mxu1 }
 0x2d8   : > { %v1292_v28 = vadd.f32 %v1522_v15, %v1425_v54  ;;  %v1283_v18 = vpop.f32.mrb[5].mxu1 }
 0x2d9   : > { %v1284_v29 = vadd.f32 %v1425_v54, %v1283_v18  ;;  %v1523_v63 = vpop.f32.mrb[6].mxu1 }
 0x2da   : > { %1337 = vst.msk [vmem:[%s2148_s30 + $0x30] sm:$0xff] %vm1330_vm0, %v1292_v28  ;;  %v1295_v33 = vadd.f32 %v1523_v63, %v1425_v54  ;;  %v1286_v30 = vpop.f32.mrb[7].mxu1 }
 0x2db   : > { %1335 = vst.msk [vmem:[%s2148_s30 + $0x20] sm:$0xff] %vm1330_vm0, %v1284_v29  ;;  %v1287_v39 = vadd.f32 %v1425_v54, %v1286_v30 }
 0x2dc   : > { %1338 = vst.msk [vmem:[%s2148_s30 + $0x38] sm:$0xff] %vm1330_vm0, %v1295_v33 }
 0x2dd   : > { %1336 = vst.msk [vmem:[%s2148_s30 + $0x28] sm:$0xff] %vm1330_vm0, %v1287_v39 }
 0x2fe   : > { %v1526_v43 = vpop.f32.mrb[8].mxu1 }
 0x2ff   : > { %v1308_v40 = vadd.f32 %v1526_v43, %v1425_v54  ;;  %v1299_v59 = vpop.f32.mrb[9].mxu1 }
 0x300   : > { %v1300_v46 = vadd.f32 %v1425_v54, %v1299_v59  ;;  %v1527_v32 = vpop.f32.mrb[10].mxu1 }
 0x301   : > { %1341 = vst.msk [vmem:[%s2148_s30 + $0x50] sm:$0xff] %vm1330_vm0, %v1308_v40  ;;  %v1311_v47 = vadd.f32 %v1527_v32, %v1425_v54  ;;  %v1302_v5 = vpop.f32.mrb[11].mxu1 }
 0x302   : > { %1339 = vst.msk [vmem:[%s2148_s30 + $0x40] sm:$0xff] %vm1330_vm0, %v1300_v46  ;;  %v1303_v62 = vadd.f32 %v1425_v54, %v1302_v5 }
 0x303   : > { %1342 = vst.msk [vmem:[%s2148_s30 + $0x58] sm:$0xff] %vm1330_vm0, %v1311_v47 }
 0x304   : > { %1340 = vst.msk [vmem:[%s2148_s30 + $0x48] sm:$0xff] %vm1330_vm0, %v1303_v62 }
 0x32a   : > { %v1530_v48 = vpop.f32.mrb[12].mxu1 }
 0x32b   : > { %v1324_v20 = vadd.f32 %v1530_v48, %v1425_v54  ;;  %v1315_v0 = vpop.f32.mrb[13].mxu1 }
 0x32c   : > { %v1316_v49 = vadd.f32 %v1425_v54, %v1315_v0  ;;  %v1531_v4 = vpop.f32.mrb[14].mxu1 }
 0x32d   : > { %1345 = vst.msk [vmem:[%s2148_s30 + $0x70] sm:$0xff] %vm1330_vm0, %v1324_v20  ;;  %v1327_v52 = vadd.f32 %v1531_v4, %v1425_v54  ;;  %v1318_v53 = vpop.f32.mrb[15].mxu1 }
 0x32e   : > { %1343 = vst.msk [vmem:[%s2148_s30 + $0x60] sm:$0xff] %vm1330_vm0, %v1316_v49  ;;  %v1319_v58 = vadd.f32 %v1425_v54, %v1318_v53 }
 0x32f   : > { %1346 = vst.msk [vmem:[%s2148_s30 + $0x78] sm:$0xff] %vm1330_vm0, %v1327_v52 }
 0x330   : > { %1344 = vst.msk [vmem:[%s2148_s30 + $0x68] sm:$0xff] %vm1330_vm0, %v1319_v58 }
 0x331 PF: > { %s20_s11 = sadd.s32 1, %s1714_s11  }
 0x332   : > { %p17_p4 = scmp.ge.s32.totalorder %s20_s11, 4  }
 0x334   :  { %19 = sbr.rel (!%p17_p4) target bundleno = 2 (0x2), region = 86 }

</bundles_post_ra>
